<compile_context>
chip_gen: v6e
topology: v6e:2x2x1
jax: 0.10.0
libtpu: 0.0.40
codegen_flags: <defaults>
</compile_context>

<pallas_src>
import jax
import jax.numpy as jnp
from jax.experimental import pallas as pl
from jax.experimental.pallas import tpu as pltpu

N_FEATURES = 16          # input_size (n_features)
HIDDEN = 120             # hidden_size1 = hidden_size2 = hidden_size3 = 120
OUTPUT_SIZE = 1
NEG_SLOPE = 0.01         # nn.LeakyReLU() default negative_slope

HIDDEN_PAD = 128         # 120 zero-padded to a full lane tile
# Padded (in, out) dims of the three MXU layers (what the kernel sees).
MXU_DIMS = ((N_FEATURES, HIDDEN_PAD),
            (HIDDEN_PAD, HIDDEN_PAD),
            (HIDDEN_PAD, HIDDEN_PAD))


def _round_up(n, m):
    return ((n + m - 1) // m) * m


def _cdiv(a, b):
    return -(-a // b)


def _leaky_relu(z):
    return jnp.where(z >= 0, z, NEG_SLOPE * z)


def mlp_kernel(x_ref,
               w1_ref, b1_ref,
               w2_ref, b2_ref,
               w3_ref, b3_ref,
               w4_ref, b4_ref,
               o_ref):
    """All four Linear + LeakyReLU layers fused, one VMEM-resident pass per tile.

    Layers 1-3: bf16 MXU operands, f32 accumulation; fused f32 epilogue
    (bias + LeakyReLU) cast straight to bf16 so only bf16 intermediates
    materialize.  Layer 4 (width 1): f32 broadcast-mul + cross-lane reduce on
    the VPU/XLU — no padded matmul, no padded writeback.
    """
    h = _leaky_relu(
        jnp.dot(x_ref[...], w1_ref[...], preferred_element_type=jnp.float32)
        + b1_ref[...]).astype(jnp.bfloat16)
    h = _leaky_relu(
        jnp.dot(h, w2_ref[...], preferred_element_type=jnp.float32)
        + b2_ref[...]).astype(jnp.bfloat16)
    h3 = _leaky_relu(
        jnp.dot(h, w3_ref[...], preferred_element_type=jnp.float32)
        + b3_ref[...])                                   # f32, feeds VPU layer
    # Layer 4: (bt,128)*(1,128) broadcast mul, lane-reduce -> (bt,1).
    o = jnp.sum(h3 * w4_ref[...], axis=-1, keepdims=True) + b4_ref[...]
    o_ref[...] = _leaky_relu(o).astype(o_ref.dtype)


def _choose_tiling(B, batch_tile):
    """Pick (batch tile, #grid steps, padded batch).

    Big tiles amortize the ~0.35us per-grid-step overhead; when the batch is
    large enough we force an even step count >= 4 so v7x's two TensorCores
    both get balanced work (harmless on single-TC v5e/v6e).
    """
    b8 = _round_up(max(B, 1), 8)
    cap = _round_up(max(8, min(batch_tile, b8)), 8)
    n = max(1, _cdiv(b8, cap))
    if b8 >= 32:                      # at least 4 tiles of 8 rows available
        if n < 4:
            n = 4
        elif n % 2 == 1:
            n += 1
    bt = _round_up(_cdiv(b8, n), 8)
    b_pad = n * bt
    return bt, n, b_pad


def neural_net_forward(x, padded_params, *, batch_tile=4096):
    """x: (B, N_FEATURES) float array. padded_params: output of pad_params()."""
    B = x.shape[0]
    assert x.shape[1] == N_FEATURES

    bt, n_tiles, b_pad = _choose_tiling(B, batch_tile)
    grid = (n_tiles,)

    xq = x.astype(jnp.bfloat16)
    if b_pad != B:
        xq = jnp.pad(xq, ((0, b_pad - B), (0, 0)))  # zero rows, sliced off later

    p = padded_params
    args = (xq,
            p["w1"], p["b1"], p["w2"], p["b2"],
            p["w3"], p["b3"], p["w4"], p["b4"])

    def resident_spec(arr):
        # Whole (~100 KiB) parameter set stays VMEM-resident with a constant
        # block index, so Pallas never re-DMAs it across grid steps.
        return pl.BlockSpec(arr.shape, lambda i: (0, 0))

    # Advisory cost: 3 MXU layers + VPU/XLU final layer, narrow f32 writeback.
    flops = 2 * b_pad * (sum(din * dout for din, dout in MXU_DIMS) + HIDDEN_PAD)
    bytes_accessed = sum(int(a.size) * int(a.dtype.itemsize) for a in args)
    bytes_accessed += b_pad * OUTPUT_SIZE * 4

    out = pl.pallas_call(
        mlp_kernel,
        out_shape=jax.ShapeDtypeStruct((b_pad, OUTPUT_SIZE), jnp.float32),
        grid_spec=pltpu.PrefetchScalarGridSpec(
            num_scalar_prefetch=0,
            grid=grid,
            in_specs=[
                pl.BlockSpec((bt, N_FEATURES), lambda i: (i, 0)),
                resident_spec(p["w1"]), resident_spec(p["b1"]),
                resident_spec(p["w2"]), resident_spec(p["b2"]),
                resident_spec(p["w3"]), resident_spec(p["b3"]),
                resident_spec(p["w4"]), resident_spec(p["b4"]),
            ],
            out_specs=pl.BlockSpec((bt, OUTPUT_SIZE), lambda i: (i, 0)),
        ),
        compiler_params=pltpu.CompilerParams(
            dimension_semantics=("parallel",),
            vmem_limit_bytes=32 * 1024 * 1024,
        ),
        cost_estimate=pl.CostEstimate(
            flops=flops, transcendentals=0, bytes_accessed=bytes_accessed),
    )(*args)

    # Drop zero-padded batch rows; output width is already the true 1.
    return out[:B, :OUTPUT_SIZE]


def init_params(key):
    """True-size f32 params matching PyTorch nn.Linear default init:
    U(-1/sqrt(fan_in), 1/sqrt(fan_in)); weights stored (in, out)."""
    dims = [(N_FEATURES, HIDDEN), (HIDDEN, HIDDEN),
            (HIDDEN, HIDDEN), (HIDDEN, OUTPUT_SIZE)]
    params = {}
    for idx, (fan_in, fan_out) in enumerate(dims, start=1):
        key, kw, kb = jax.random.split(key, 3)
        bound = 1.0 / float(fan_in) ** 0.5
        params[f"w{idx}"] = jax.random.uniform(
            kw, (fan_in, fan_out), jnp.float32, -bound, bound)
        params[f"b{idx}"] = jax.random.uniform(
            kb, (1, fan_out), jnp.float32, -bound, bound)
    return params


def pad_params(params):
    """Zero-pad hidden dims 120->128 so all tiles are (8,128)-aligned.

    Layers 1-3: weights -> bf16 MXU operands (in, 128), biases f32 (1, 128).
    Layer 4:   weight kept f32 as a (1, 128) row vector for the VPU reduce,
               bias f32 (1, 1).  Padding is inert (zeros, LeakyReLU(0)==0).
    """
    padded = {}
    for idx, (din, dout) in enumerate(MXU_DIMS, start=1):
        w = params[f"w{idx}"]
        b = params[f"b{idx}"]
        wp = jnp.zeros((din, dout), jnp.float32).at[:w.shape[0], :w.shape[1]].set(w)
        bp = jnp.zeros((1, dout), jnp.float32).at[:, :b.shape[1]].set(b)
        padded[f"w{idx}"] = wp.astype(jnp.bfloat16)
        padded[f"b{idx}"] = bp
    w4 = params["w4"]                                     # (HIDDEN, 1)
    padded["w4"] = jnp.zeros((1, HIDDEN_PAD), jnp.float32).at[0, :HIDDEN].set(w4[:, 0])
    padded["b4"] = params["b4"].reshape(1, 1).astype(jnp.float32)
    return padded


def reference_forward(x, params, *, emulate_kernel_precision=False):
    """Pure-JAX reference of the PyTorch forward on the true-size f32 params.

    With emulate_kernel_precision=True, layers 1-3 round their operands to
    bf16 (as the kernel's MXU dots do); layer 4 stays full f32, matching the
    kernel's VPU final layer.
    """
    hp = jax.lax.Precision.HIGHEST
    h = x
    for idx in range(1, 4):
        w = params[f"w{idx}"]
        b = params[f"b{idx}"]
        if emulate_kernel_precision:
            h = h.astype(jnp.bfloat16).astype(jnp.float32)
            w = w.astype(jnp.bfloat16).astype(jnp.float32)
        h = jnp.dot(h, w, preferred_element_type=jnp.float32, precision=hp) + b
        h = jnp.where(h >= 0, h, NEG_SLOPE * h)
    h = jnp.dot(h, params["w4"], preferred_element_type=jnp.float32,
                precision=hp) + params["b4"]
    return jnp.where(h >= 0, h, NEG_SLOPE * h)


if __name__ == "__main__":
    key = jax.random.PRNGKey(0)
    key, kx = jax.random.split(key)
    batch = 64  # small demo batch; tile chooser splits it into 4 parallel tiles
    x = jax.random.normal(kx, (batch, N_FEATURES), jnp.float32)

    params = init_params(key)
    padded = pad_params(params)

    out = neural_net_forward(x, padded, batch_tile=4096)
    out = jax.block_until_ready(out)
    assert out.shape == (batch, OUTPUT_SIZE)

    # Tight check vs. a reference that mimics the kernel's bf16 operand rounding.
    ref_kernel_prec = reference_forward(x, params, emulate_kernel_precision=True)
    assert jnp.allclose(out, ref_kernel_prec, atol=2e-3, rtol=2e-3), (
        float(jnp.max(jnp.abs(out - ref_kernel_prec))))

    # Looser check vs. the exact f32 PyTorch-equivalent forward.
    ref_f32 = reference_forward(x, params)
    assert jnp.allclose(out, ref_f32, atol=2e-2, rtol=2e-2), (
        float(jnp.max(jnp.abs(out - ref_f32))))

    print("KERNEL_OK")
</pallas_src>

<mosaic_0001>
module attributes {stable_mosaic.version = 11 : i64} {
  func.func @mlp_kernel(%arg0: i32, %arg1: memref<16x16xbf16, #tpu.memory_space<vmem>>, %arg2: memref<16x128xbf16, #tpu.memory_space<vmem>>, %arg3: memref<1x128xf32, #tpu.memory_space<vmem>>, %arg4: memref<128x128xbf16, #tpu.memory_space<vmem>>, %arg5: memref<1x128xf32, #tpu.memory_space<vmem>>, %arg6: memref<128x128xbf16, #tpu.memory_space<vmem>>, %arg7: memref<1x128xf32, #tpu.memory_space<vmem>>, %arg8: memref<1x128xf32, #tpu.memory_space<vmem>>, %arg9: memref<1x1xf32, #tpu.memory_space<vmem>>, %arg10: memref<16x1xf32, #tpu.memory_space<vmem>>) attributes {dimension_semantics = [#tpu.dimension_semantics<parallel>], iteration_bounds = array<i64: 4>, scalar_prefetch = 0 : i64, scratch_operands = 0 : i64, tpu.core_type = #tpu.core_type<tc>, window_params = [{transform_indices = @transform_0, window_bounds = array<i64: 16, 16>}, {pipeline_mode = #tpu.pipeline_mode<synchronous>, transform_indices = @transform_1, window_bounds = array<i64: 16, 128>}, {pipeline_mode = #tpu.pipeline_mode<synchronous>, transform_indices = @transform_2, window_bounds = array<i64: 1, 128>}, {pipeline_mode = #tpu.pipeline_mode<synchronous>, transform_indices = @transform_3, window_bounds = array<i64: 128, 128>}, {pipeline_mode = #tpu.pipeline_mode<synchronous>, transform_indices = @transform_4, window_bounds = array<i64: 1, 128>}, {pipeline_mode = #tpu.pipeline_mode<synchronous>, transform_indices = @transform_5, window_bounds = array<i64: 128, 128>}, {pipeline_mode = #tpu.pipeline_mode<synchronous>, transform_indices = @transform_6, window_bounds = array<i64: 1, 128>}, {pipeline_mode = #tpu.pipeline_mode<synchronous>, transform_indices = @transform_7, window_bounds = array<i64: 1, 128>}, {pipeline_mode = #tpu.pipeline_mode<synchronous>, transform_indices = @transform_8, window_bounds = array<i64: 1, 1>}, {transform_indices = @transform_9, window_bounds = array<i64: 16, 1>}]} {
    %c0 = arith.constant 0 : index
    %c0_0 = arith.constant 0 : index
    %0 = vector.load %arg1[%c0, %c0_0] : memref<16x16xbf16, #tpu.memory_space<vmem>>, vector<16x16xbf16>
    %c0_1 = arith.constant 0 : index
    %c0_2 = arith.constant 0 : index
    %1 = vector.load %arg2[%c0_1, %c0_2] : memref<16x128xbf16, #tpu.memory_space<vmem>>, vector<16x128xbf16>
    %cst = arith.constant dense<0.000000e+00> : vector<16x128xf32>
    %2 = tpu.matmul %0, %1, %cst {dimension_numbers = #tpu.dot_dimension_numbers<[1], [0], [0], [1], [0, 0, 1, 1], [], []>} : vector<16x16xbf16>, vector<16x128xbf16>, vector<16x128xf32> -> vector<16x128xf32>
    %c0_3 = arith.constant 0 : index
    %c0_4 = arith.constant 0 : index
    %3 = vector.load %arg3[%c0_3, %c0_4] : memref<1x128xf32, #tpu.memory_space<vmem>>, vector<1x128xf32>
    %4 = vector.broadcast %3 : vector<1x128xf32> to vector<16x128xf32>
    %5 = arith.addf %2, %4 : vector<16x128xf32>
    %cst_5 = arith.constant 0.000000e+00 : f32
    %6 = vector.broadcast %cst_5 : f32 to vector<16x128xf32>
    %7 = arith.cmpf oge, %5, %6 : vector<16x128xf32>
    %cst_6 = arith.constant 0.00999999977 : f32
    %8 = vector.broadcast %cst_6 : f32 to vector<16x128xf32>
    %9 = arith.mulf %8, %5 : vector<16x128xf32>
    %10 = arith.select %7, %5, %9 : vector<16x128xi1>, vector<16x128xf32>
    %11 = arith.truncf %10 : vector<16x128xf32> to vector<16x128xbf16>
    %c0_7 = arith.constant 0 : index
    %c0_8 = arith.constant 0 : index
    %12 = vector.load %arg4[%c0_7, %c0_8] : memref<128x128xbf16, #tpu.memory_space<vmem>>, vector<128x128xbf16>
    %cst_9 = arith.constant dense<0.000000e+00> : vector<16x128xf32>
    %13 = tpu.matmul %11, %12, %cst_9 {dimension_numbers = #tpu.dot_dimension_numbers<[1], [0], [0], [1], [0, 0, 1, 1], [], []>} : vector<16x128xbf16>, vector<128x128xbf16>, vector<16x128xf32> -> vector<16x128xf32>
    %c0_10 = arith.constant 0 : index
    %c0_11 = arith.constant 0 : index
    %14 = vector.load %arg5[%c0_10, %c0_11] : memref<1x128xf32, #tpu.memory_space<vmem>>, vector<1x128xf32>
    %15 = vector.broadcast %14 : vector<1x128xf32> to vector<16x128xf32>
    %16 = arith.addf %13, %15 : vector<16x128xf32>
    %cst_12 = arith.constant 0.000000e+00 : f32
    %17 = vector.broadcast %cst_12 : f32 to vector<16x128xf32>
    %18 = arith.cmpf oge, %16, %17 : vector<16x128xf32>
    %cst_13 = arith.constant 0.00999999977 : f32
    %19 = vector.broadcast %cst_13 : f32 to vector<16x128xf32>
    %20 = arith.mulf %19, %16 : vector<16x128xf32>
    %21 = arith.select %18, %16, %20 : vector<16x128xi1>, vector<16x128xf32>
    %22 = arith.truncf %21 : vector<16x128xf32> to vector<16x128xbf16>
    %c0_14 = arith.constant 0 : index
    %c0_15 = arith.constant 0 : index
    %23 = vector.load %arg6[%c0_14, %c0_15] : memref<128x128xbf16, #tpu.memory_space<vmem>>, vector<128x128xbf16>
    %cst_16 = arith.constant dense<0.000000e+00> : vector<16x128xf32>
    %24 = tpu.matmul %22, %23, %cst_16 {dimension_numbers = #tpu.dot_dimension_numbers<[1], [0], [0], [1], [0, 0, 1, 1], [], []>} : vector<16x128xbf16>, vector<128x128xbf16>, vector<16x128xf32> -> vector<16x128xf32>
    %c0_17 = arith.constant 0 : index
    %c0_18 = arith.constant 0 : index
    %25 = vector.load %arg7[%c0_17, %c0_18] : memref<1x128xf32, #tpu.memory_space<vmem>>, vector<1x128xf32>
    %26 = vector.broadcast %25 : vector<1x128xf32> to vector<16x128xf32>
    %27 = arith.addf %24, %26 : vector<16x128xf32>
    %cst_19 = arith.constant 0.000000e+00 : f32
    %28 = vector.broadcast %cst_19 : f32 to vector<16x128xf32>
    %29 = arith.cmpf oge, %27, %28 : vector<16x128xf32>
    %cst_20 = arith.constant 0.00999999977 : f32
    %30 = vector.broadcast %cst_20 : f32 to vector<16x128xf32>
    %31 = arith.mulf %30, %27 : vector<16x128xf32>
    %32 = arith.select %29, %27, %31 : vector<16x128xi1>, vector<16x128xf32>
    %c0_21 = arith.constant 0 : index
    %c0_22 = arith.constant 0 : index
    %33 = vector.load %arg8[%c0_21, %c0_22] : memref<1x128xf32, #tpu.memory_space<vmem>>, vector<1x128xf32>
    %34 = vector.broadcast %33 : vector<1x128xf32> to vector<16x128xf32>
    %35 = arith.mulf %32, %34 : vector<16x128xf32>
    %cst_23 = arith.constant dense<0.000000e+00> : vector<16xf32>
    %36 = vector.multi_reduction <add>, %35, %cst_23 [1] : vector<16x128xf32> to vector<16xf32>
    %37 = vector.shape_cast %36 : vector<16xf32> to vector<16x1xf32>
    %c0_24 = arith.constant 0 : index
    %c0_25 = arith.constant 0 : index
    %38 = vector.load %arg9[%c0_24, %c0_25] : memref<1x1xf32, #tpu.memory_space<vmem>>, vector<1x1xf32>
    %39 = vector.broadcast %38 : vector<1x1xf32> to vector<16x1xf32>
    %40 = arith.addf %37, %39 : vector<16x1xf32>
    %cst_26 = arith.constant 0.000000e+00 : f32
    %41 = vector.broadcast %cst_26 : f32 to vector<16x1xf32>
    %42 = arith.cmpf oge, %40, %41 : vector<16x1xf32>
    %cst_27 = arith.constant 0.00999999977 : f32
    %43 = vector.broadcast %cst_27 : f32 to vector<16x1xf32>
    %44 = arith.mulf %43, %40 : vector<16x1xf32>
    %45 = arith.select %42, %40, %44 : vector<16x1xi1>, vector<16x1xf32>
    %c0_28 = arith.constant 0 : index
    %c0_29 = arith.constant 0 : index
    %46 = vector.load %arg10[%c0_28, %c0_29] : memref<16x1xf32, #tpu.memory_space<vmem>>, vector<16x1xf32>
    tpu.vector_store %arg10[%c0_28, %c0_29], %45 {strides = array<i32>} : memref<16x1xf32, #tpu.memory_space<vmem>>, vector<16x1xf32>,
    return
  }
  func.func @transform_0(%arg0: i32) -> (i32, i32) {
    %c0_i32 = arith.constant 0 : i32
    %c0_i32_0 = arith.constant 0 : i32
    return %arg0, %c0_i32 : i32, i32
  }
  func.func @transform_1(%arg0: i32) -> (i32, i32) {
    %c0_i32 = arith.constant 0 : i32
    %c0_i32_0 = arith.constant 0 : i32
    %c0_i32_1 = arith.constant 0 : i32
    return %c0_i32, %c0_i32_0 : i32, i32
  }
  func.func @transform_2(%arg0: i32) -> (i32, i32) {
    %c0_i32 = arith.constant 0 : i32
    %c0_i32_0 = arith.constant 0 : i32
    %c0_i32_1 = arith.constant 0 : i32
    return %c0_i32, %c0_i32_0 : i32, i32
  }
  func.func @transform_3(%arg0: i32) -> (i32, i32) {
    %c0_i32 = arith.constant 0 : i32
    %c0_i32_0 = arith.constant 0 : i32
    %c0_i32_1 = arith.constant 0 : i32
    return %c0_i32, %c0_i32_0 : i32, i32
  }
  func.func @transform_4(%arg0: i32) -> (i32, i32) {
    %c0_i32 = arith.constant 0 : i32
    %c0_i32_0 = arith.constant 0 : i32
    %c0_i32_1 = arith.constant 0 : i32
    return %c0_i32, %c0_i32_0 : i32, i32
  }
  func.func @transform_5(%arg0: i32) -> (i32, i32) {
    %c0_i32 = arith.constant 0 : i32
    %c0_i32_0 = arith.constant 0 : i32
    %c0_i32_1 = arith.constant 0 : i32
    return %c0_i32, %c0_i32_0 : i32, i32
  }
  func.func @transform_6(%arg0: i32) -> (i32, i32) {
    %c0_i32 = arith.constant 0 : i32
    %c0_i32_0 = arith.constant 0 : i32
    %c0_i32_1 = arith.constant 0 : i32
    return %c0_i32, %c0_i32_0 : i32, i32
  }
  func.func @transform_7(%arg0: i32) -> (i32, i32) {
    %c0_i32 = arith.constant 0 : i32
    %c0_i32_0 = arith.constant 0 : i32
    %c0_i32_1 = arith.constant 0 : i32
    return %c0_i32, %c0_i32_0 : i32, i32
  }
  func.func @transform_8(%arg0: i32) -> (i32, i32) {
    %c0_i32 = arith.constant 0 : i32
    %c0_i32_0 = arith.constant 0 : i32
    %c0_i32_1 = arith.constant 0 : i32
    return %c0_i32, %c0_i32_0 : i32, i32
  }
  func.func @transform_9(%arg0: i32) -> (i32, i32) {
    %c0_i32 = arith.constant 0 : i32
    %c0_i32_0 = arith.constant 0 : i32
    return %arg0, %c0_i32 : i32, i32
  }
}

</mosaic_0001>

<bundles_post_ra>
// kernel: tpu_custom_call.1
= control target key start
LH: loop header
LB: loop body
LE: loop exit
PB: predicated region body
PF: predicated region fallthrough
CT: control target
= control target key end

     0   :  { %s1179_s0 = inlined_call_operand.vmem [shape: bf16[64,16], index: 0, kind: input, shape index: {}]   ;;  %s1180_s1 = inlined_call_operand.vmem [shape: bf16[16,128], index: 1, kind: input, shape index: {}]   ;;  %s1181_s2 = inlined_call_operand.vmem [shape: f32[1,128], index: 2, kind: input, shape index: {}]   ;;  %s1182_s3 = inlined_call_operand.hbm [shape: bf16[128,128], index: 3, kind: input, shape index: {}]   ;;  %s1183_s4 = inlined_call_operand.vmem [shape: f32[1,128], index: 4, kind: input, shape index: {}]   ;;  %s1184_s5 = inlined_call_operand.hbm [shape: bf16[128,128], index: 5, kind: input, shape index: {}]   ;;  %s1185_s6 = inlined_call_operand.vmem [shape: f32[1,128], index: 6, kind: input, shape index: {}]   ;;  %s1186_s7 = inlined_call_operand.vmem [shape: f32[1,128], index: 7, kind: input, shape index: {}]   ;;  %s1187_s8 = inlined_call_operand.<no memory space> [shape: f32[1,1], index: 8, kind: input, shape index: {}]   ;;  %s1188_s9 = inlined_call_operand.vmem [shape: f32[64,1], index: 9, kind: output, shape index: {}]  }
   0x1   :  { %v14_v0 = vstv %s1187_s8 }
   0x2   :  { %15 = vst [vmem:[#allocation2] sm:$0x1] %v14_v0 }
   0x3   :  { %16 = vsyncpa [#allocation4], 0 }
   0x4   :  { %17 = vsyncpa [#allocation6], 0  ;;  %s1072_s11 = smov 0  }
   0x5 LB: > { %s789_s12 = sadd.s32 4294967295, %s1011_s11   ;;  %p791_p0 = scmp.ge.s32.totalorder %s1011_s11, 1  ;;  %s1011_s11 = sphi %s1072_s11, %s23_s11  }
   0x6   : > { %p248_p1 = scmp.lt.s32.totalorder %s1011_s11, 5  ;;  %s1013_s13 = smov [#allocation3]  }
   0x7   : > { %s266_s14 = sshll.u32 %s1013_s13, 4  ;;  %p1086_p3 = scmp.eq.s32.totalorder %s789_s12, 0  ;;  %s267_s14 = int_to_ptr.vmem [resolvable:$true] %s266_s14 }
   0x8   : > { %p1080_p2 = pnand %p791_p0, %p248_p1  ;;  %s1014_s16 = smov [#allocation5]  }
   0x9   : > { %s282_s17 = sshll.u32 %s1014_s16, 4  ;;  %s956_s19 = scalar_lea.vmem %s267_s14, 1024  ;;  %s283_s17 = int_to_ptr.vmem [resolvable:$true] %s282_s17 }
   0xa   : > { %p902_p4 = pneg %p1080_p2  ;;  %p957_p7 = scmp.ne.s32.totalorder %s267_s14, %s956_s19 }
   0xb   : > { %p964_p10 = scmp.lt.s32.totalorder %s267_s14, %s267_s14  ;;  %p965_p11 = scmp.lt.s32.totalorder %s956_s19, %s956_s19 }
   0xc   : > { %p1094_p5 = pnand %p1086_p3, %p902_p4 }
   0xd   : > { %p966_p12 = por %p965_p11, %p964_p10 }
   0xe   : > { %p947_p6 = pneg %p1094_p5 }
  0x10   : > { %p959_p8 = pnand %p957_p7, %p947_p6 }
  0x12   : > { %p960_p9 = pneg %p959_p8 }
  0x14   : > { %p967_p13 = pnand %p966_p12, %p960_p9 }
  0x16   : > { %970 = shalt.err (!%p967_p13)
}
  0x17   : > { %s1015_s20 = smov 64   ;;  %s1016_s21 = smov 4  }
  0x18   : > { %905 = dma.hbm_to_vmem [thread:$0]  (!%p1094_p5), %s1182_s3, 1024, %s267_s14, [#allocation4], %s1015_s20, %s1015_s20, %s1016_s21  }
  0x19   : > { %s982_s24 = scalar_lea.vmem %s283_s17, 1024  ;;  %p990_p7 = scmp.lt.s32.totalorder %s283_s17, %s283_s17 }
  0x1a   : > { %p983_p0 = scmp.ne.s32.totalorder %s283_s17, %s982_s24  ;;  %p991_p8 = scmp.lt.s32.totalorder %s982_s24, %s982_s24 }
  0x1c   : > { %p985_p1 = pnand %p983_p0, %p947_p6  ;;  %p992_p10 = por %p991_p8, %p990_p7 }
  0x1e   : > { %p986_p4 = pneg %p985_p1 }
  0x20   : > { %p993_p9 = pnand %p992_p10, %p986_p4 }
  0x22   : > { %996 = shalt.err (!%p993_p9)
}
  0x23   : > { %908 = dma.hbm_to_vmem [thread:$0]  (!%p1094_p5), %s1184_s5, 1024, %s283_s17, [#allocation6], %s1015_s20, %s1015_s20, %s1016_s21  }
  0x24   : > { %316 = sbr.rel (%p1080_p2) target bundleno = 807 (0x327), region = 56 }
  0x29   : > { %1002 = dma.done.wait (%p1086_p3), [#allocation4], 1024  }
  0x2a   : > { %1004 = vsyncadd (%p1086_p3), [#allocation4], 4294966272 }
  0x2b   : > { %1006 = dma.done.wait (%p1086_p3), [#allocation6], 1024  }
  0x2c   : > { %1008 = vsyncadd (%p1086_p3), [#allocation6], 4294966272  ;;  %s798_s27 = sshll.u32 %s789_s12, 1  ;;  %v1017_v1 = vmov 0.0   ;;  %vm1018_vm0 = vmmov 0   ;;  %v927_v2 = vld [vmem:[%s1180_s1] sm:$0xff]  }
  0x2d   : > { %848 = vmatprep.subr.bf16.mxu0 %v1017_v1  ;;  %850 = vmatprep.mubr.msk.bf16.mxu0 %vm1018_vm0, %v1017_v1  ;;  %p357_p2 = scmp.lt.s32.totalorder %s798_s27, 7  ;;  %vm391_vm1 = vcmask 130048   ;;  %v929_v4 = vld [vmem:[#allocation3 + $0x38] sm:$0xff]   ;;  %v930_v5 = vld [vmem:[#allocation3 + $0x30] sm:$0xff]   ;;  %v931_v6 = vld [vmem:[#allocation3 + $0x28] sm:$0xff]   ;;  %vm708_vm8 = vcmask 7168  }
  0x2e   : > { %854 = vmatprep.subr.bf16.mxu1 %v1017_v1  ;;  %870 = vmatprep.mubr.msk.bf16.mxu1 %vm1018_vm0, %v1017_v1  ;;  %v932_v7 = vld [vmem:[#allocation3 + $0x20] sm:$0xff]   ;;  %v933_v8 = vld [vmem:[#allocation3 + $0x18] sm:$0xff]   ;;  %v934_v9 = vld [vmem:[#allocation3 + $0x10] sm:$0xff]  }
  0x2f   : > { %s1193_s27 = smov (!%p357_p2, %s798_s27), 7  ;;  %849 = vmatpush3.bf16.msra.mxu0 %v927_v2  ;;  %855 = vmatpush3.bf16.msra.mxu1 %v929_v4  ;;  %v935_v10 = vld [vmem:[#allocation3 + $0x8] sm:$0xff]   ;;  %v936_v11 = vld [vmem:[#allocation3] sm:$0xff]   ;;  %v937_v12 = vld [vmem:[#allocation5 + $0x38] sm:$0xff]  }
  0x30   : > { %s799_s28 = sshll.u32 %s1193_s27, 2  ;;  %874 = vmatprep.subr.bf16.mxu0 %v1017_v1  ;;  %856 = vmatprep.subr.bf16.mxu1 %v1017_v1  ;;  %v938_v13 = vld [vmem:[#allocation5 + $0x30] sm:$0xff]   ;;  %v939_v14 = vld [vmem:[#allocation5 + $0x28] sm:$0xff]   ;;  %v940_v15 = vld [vmem:[#allocation5 + $0x20] sm:$0xff]   ;;  %s801_s21 = sshll.u32 %s1193_s27, 3 }
  0x31   : > { %s360_s10 = scalar_lea.vmem %s1179_s0, %s799_s28  ;;  %v941_v16 = vld [vmem:[#allocation5 + $0x18] sm:$0xff]   ;;  %v942_v29 = vld [vmem:[#allocation5 + $0x10] sm:$0xff]   ;;  %v943_v30 = vld [vmem:[#allocation5 + $0x8] sm:$0xff]   ;;  %s366_s24 = scalar_lea.vmem %s1188_s9, %s801_s21 }
  0x32   : > { %v928_v3 = vld [vmem:[%s360_s10] sm:$0xff]  }
  0x33   : > { %851 = vmatmul.mubr.msk.bf16.vlgmr.msra.gmra.mxu0 %vm391_vm1, %v928_v3  ;;  %857 = vmatpush3.bf16.msra.mxu1 %v930_v5  ;;  %v802_v17 = vld [vmem:[%s1181_s2] ss:$0 sm:$0xff]  ;;  %v944_v31 = vld [vmem:[#allocation5] sm:$0xff]  }
  0x34   : > { %890 = vmatprep.mubr.msk.bf16.mxu0 %vm1018_vm0, %v1017_v1  ;;  %858 = vmatprep.subr.bf16.mxu1 %v1017_v1  ;;  %v806_v32 = vld [vmem:[%s1183_s4] ss:$0 sm:$0xff] }
  0x35   : > { %875 = vmatpush3.bf16.msra.mxu0 %v937_v12  ;;  %v815_v44 = vld [vmem:[%s1185_s6] ss:$0 sm:$0xff] }
  0x36   : > { %876 = vmatprep.subr.bf16.mxu0 %v1017_v1  ;;  %v824_v49 = vld [vmem:[%s1186_s7] ss:$0 sm:$0xff] }
  0x37   : > { %859 = vmatpush3.bf16.msra.mxu1 %v931_v6  ;;  %v825_v58 = vld [vmem:[#allocation2] ss:$0 sm:$0xff] }
  0x38   : > { %860 = vmatprep.subr.bf16.mxu1 %v1017_v1 }
  0x39   : > { %877 = vmatpush3.bf16.msra.mxu0 %v938_v13 }
  0x3a   : > { %878 = vmatprep.subr.bf16.mxu0 %v1017_v1 }
  0x3b   : > { %861 = vmatpush3.bf16.msra.mxu1 %v932_v7 }
  0x3c   : > { %862 = vmatprep.subr.bf16.mxu1 %v1017_v1 }
  0x3d   : > { %879 = vmatpush3.bf16.msra.mxu0 %v939_v14 }
  0x3e   : > { %880 = vmatprep.subr.bf16.mxu0 %v1017_v1 }
  0x3f   : > { %863 = vmatpush3.bf16.msra.mxu1 %v933_v8 }
  0x40   : > { %864 = vmatprep.subr.bf16.mxu1 %v1017_v1 }
  0x41   : > { %881 = vmatpush3.bf16.msra.mxu0 %v940_v15 }
  0x42   : > { %882 = vmatprep.subr.bf16.mxu0 %v1017_v1 }
  0x43   : > { %865 = vmatpush3.bf16.msra.mxu1 %v934_v9 }
  0x44   : > { %866 = vmatprep.subr.bf16.mxu1 %v1017_v1 }
  0x45   : > { %883 = vmatpush3.bf16.msra.mxu0 %v941_v16 }
  0x46   : > { %884 = vmatprep.subr.bf16.mxu0 %v1017_v1 }
  0x47   : > { %867 = vmatpush3.bf16.msra.mxu1 %v935_v10 }
  0x48   : > { %868 = vmatprep.subr.bf16.mxu1 %v1017_v1 }
  0x49   : > { %885 = vmatpush3.bf16.msra.mxu0 %v942_v29 }
  0x4a   : > { %886 = vmatprep.subr.bf16.mxu0 %v1017_v1 }
  0x4b   : > { %869 = vmatpush3.bf16.msra.mxu1 %v936_v11 }
  0x4d   : > { %887 = vmatpush3.bf16.msra.mxu0 %v943_v30 }
  0x4e   : > { %888 = vmatprep.subr.bf16.mxu0 %v1017_v1 }
  0x51   : > { %889 = vmatpush3.bf16.msra.mxu0 %v944_v31 }
  0xf3   : > { %v429_v18 = vpop.f32.mrf.mxu0 }
  0xf4   : > { %v430_v19 = vadd.f32 %v802_v17, %v429_v18 }
  0xf5   : > { %v852_v20 = vpop.f32.mrf.mxu0 }
  0xf6   : > { %v438_v22 = vmul.f32 0.01, %v430_v19  ;;  %vm436_vm2 = vcmp.ge.f32.partialorder %v430_v19, 0.0 }
  0xf7   : > { %v432_v21 = vpop.f32.mrf.mxu0 }
  0xf8   : > { %v433_v23 = vadd.f32 %v802_v17, %v432_v21  ;;  %v440_v26 = vsel %vm436_vm2, %v430_v19, %v438_v22 }
  0xf9   : > { %v853_v24 = vpop.f32.mrf.mxu0 }
  0xfa   : > { %vm437_vm3 = vcmp.ge.f32.partialorder %v433_v23, 0.0  ;;  %v439_v25 = vmul.f32 0.01, %v433_v23 }
  0xfc   : > { %v441_v27 = vsel %vm437_vm3, %v433_v23, %v439_v25 }
  0xfd   : > { %v442_v28 = vpack.c.bf16 %v441_v27, %v440_v26 }
  0xff   : > { %871 = vmatmul.mubr.bf16.vlgmr.msra.gmra.mxu1 %v442_v28 }
 0x1bf   : > { %v548_v33 = vpop.f32.mrf.mxu1 }
 0x1c0   : > { %v549_v34 = vadd.f32 %v806_v32, %v548_v33 }
 0x1c1   : > { %v872_v35 = vpop.f32.mrf.mxu1 }
 0x1c2   : > { %v557_v37 = vmul.f32 0.01, %v549_v34  ;;  %vm555_vm4 = vcmp.ge.f32.partialorder %v549_v34, 0.0 }
 0x1c3   : > { %v551_v36 = vpop.f32.mrf.mxu1 }
 0x1c4   : > { %v552_v38 = vadd.f32 %v806_v32, %v551_v36  ;;  %v559_v41 = vsel %vm555_vm4, %v549_v34, %v557_v37 }
 0x1c5   : > { %v873_v39 = vpop.f32.mrf.mxu1 }
 0x1c6   : > { %vm556_vm5 = vcmp.ge.f32.partialorder %v552_v38, 0.0  ;;  %v558_v40 = vmul.f32 0.01, %v552_v38 }
 0x1c8   : > { %v560_v42 = vsel %vm556_vm5, %v552_v38, %v558_v40 }
 0x1c9   : > { %v561_v43 = vpack.c.bf16 %v560_v42, %v559_v41 }
 0x1cb   : > { %891 = vmatmul.mubr.bf16.vlgmr.msra.gmra.mxu0 %v561_v43 }
 0x28b   : > { %v667_v45 = vpop.f32.mrf.mxu0 }
 0x28c   : > { %v668_v46 = vadd.f32 %v815_v44, %v667_v45 }
 0x28d   : > { %v892_v47 = vpop.f32.mrf.mxu0 }
 0x28e   : > { %v676_v48 = vmul.f32 0.01, %v668_v46  ;;  %vm674_vm6 = vcmp.ge.f32.partialorder %v668_v46, 0.0 }
 0x28f   : > { %v670_v50 = vpop.f32.mrf.mxu0 }
 0x290   : > { %v671_v51 = vadd.f32 %v815_v44, %v670_v50  ;;  %v678_v52 = vsel %vm674_vm6, %v668_v46, %v676_v48 }
 0x291   : > { %v893_v53 = vpop.f32.mrf.mxu0  ;;  %v687_v54 = vmul.f32 %v824_v49, %v678_v52 }
 0x292   : > { %v677_v55 = vmul.f32 0.01, %v671_v51  ;;  %vm675_vm7 = vcmp.ge.f32.partialorder %v671_v51, 0.0 }
 0x293   : > { %689 = vadd.xlane.f32.xlu0 %v687_v54 }
 0x294   : > { %v679_v56 = vsel %vm675_vm7, %v671_v51, %v677_v55 }
 0x295   : > { %v688_v57 = vmul.f32 %v824_v49, %v679_v56 }
 0x297   : > { %691 = vadd.xlane.f32.xlu0 %v688_v57 }
 0x31c   : > { %v690_v59 = vpop.xlane.xlu0 %689 }
 0x31d   : > { %v700_v60 = vadd.f32 %v825_v58, %v690_v59 }
 0x31f   : > { %vm702_vm9 = vcmp.ge.f32.partialorder %v700_v60, 0.0  ;;  %v704_v61 = vmul.f32 0.01, %v700_v60 }
 0x320   : > { %v692_v62 = vpop.xlane.xlu0 %691 }
 0x321   : > { %v706_v63 = vsel %vm702_vm9, %v700_v60, %v704_v61  ;;  %v701_v0 = vadd.f32 %v825_v58, %v692_v62 }
 0x322   : > { %709 = vst.msk [vmem:[%s366_s24] sm:$0xff] %vm708_vm8, %v706_v63 }
 0x323   : > { %vm703_vm10 = vcmp.ge.f32.partialorder %v701_v0, 0.0  ;;  %v705_v1 = vmul.f32 0.01, %v701_v0 }
 0x325   : > { %v707_v2 = vsel %vm703_vm10, %v701_v0, %v705_v1 }
 0x326   : > { %710 = vst.msk [vmem:[%s366_s24 + $0x8] sm:$0xff] %vm708_vm8, %v707_v2 }
 0x327 PF: > { %s23_s11 = sadd.s32 1, %s1011_s11  }
 0x328   : > { %p20_p3 = scmp.ge.s32.totalorder %s23_s11, 6  }
 0x32a   :  { %22 = sbr.rel (!%p20_p3) target bundleno = 5 (0x5), region = 95 }
 0x32f   :  { %733 = vsyncpa [#allocation4], 1 }
 0x330   :  { %735 = vsyncpa [#allocation4 + $0x1], 1 }
 0x331   :  { %736 = vsyncpa [#allocation6], 1 }

</bundles_post_ra>
